<compile_context>
chip_gen: v5e
topology: v5e:2x2
jax: 0.10.0
libtpu: 0.0.40
codegen_flags: <defaults>
</compile_context>

<pallas_src>
import functools

import jax
import jax.numpy as jnp
from jax.experimental import pallas as pl
from jax.experimental.pallas import tpu as pltpu


# ---------------------------------------------------------------------------
# Per-generation configuration.
# ---------------------------------------------------------------------------
def _hw_config():
    try:
        kind = jax.devices()[0].device_kind.lower()
    except Exception:
        kind = ""
    if ("v5" in kind) or ("v6" in kind):
        # 128 MiB physical VMEM parts: larger tiles, generous scoped limit.
        return {"vmem": 100 * 1024 * 1024, "tm": 1024, "tq": 512, "tk": 512, "hb": 4}
    # v7x (64 MiB physical VMEM) or unknown generation: conservative budget.
    # f32 QKV weights at E=1152 double-buffer to ~32 MB; tm=256 keeps x/out
    # blocks small enough to stay under the 48 MB cap.
    # TODO(synk): mark the constant weight/bias BlockSpecs pipeline_mode=
    # pl.Buffered(1) (their index_map is constant, nothing to pipeline) to win
    # back ~16 MB and allow a larger tm on v7x.
    return {"vmem": 48 * 1024 * 1024, "tm": 256, "tq": 512, "tk": 256, "hb": 4}


_CFG = _hw_config()


def _pick_seq_tile(dim, preferred):
    """Largest divisor of `dim` <= preferred that is a multiple of 8 (sublane dim)."""
    if dim <= preferred:
        return dim
    for t in range(preferred, 7, -1):
        if dim % t == 0 and t % 8 == 0:
            return t
    # TODO(synk): pad S + mask instead of a full-S tile for awkward S (e.g. 729).
    return dim


def _pick_div(dim, preferred):
    """Largest divisor of `dim` <= preferred (axis not subject to the (8,128) rule)."""
    if dim <= preferred:
        return dim
    for t in range(preferred, 0, -1):
        if dim % t == 0:
            return t
    return 1


def _fast_recip(x):
    # EUP approximate reciprocal + one Newton step: no divide, ~f32 accuracy.
    r = pl.reciprocal(x, approx=True)
    return r * (2.0 - x * r)


# ---------------------------------------------------------------------------
# Fused Q/K/V projection. One read of hidden_states feeds three full-width
# (tm, E) @ (E, E) matmuls (full MXU N-utilization); results are then split
# per head with cheap in-VMEM lane slices and stored directly in (B, H, S, D)
# layout, so no HBM transpose is ever needed. q is stored pre-scaled.
# ---------------------------------------------------------------------------
def _qkv_kernel(x_ref, wq_ref, wk_ref, wv_ref, bq_ref, bk_ref, bv_ref,
                q_ref, k_ref, v_ref, *, scale):
    x = x_ref[0]                                       # (tm, E), model dtype
    H, D = q_ref.shape[1], q_ref.shape[3]

    def proj(w_ref, b_ref, out_ref, s):
        y = jnp.dot(x, w_ref[...], preferred_element_type=jnp.float32)
        y = y + b_ref[...]
        if s is not None:
            y = y * s                                  # fold softmax scale into q
        for h in range(H):                             # static unroll: lane-slice split
            out_ref[0, h] = y[:, h * D:(h + 1) * D].astype(out_ref.dtype)

    proj(wq_ref, bq_ref, q_ref, scale)
    proj(wk_ref, bk_ref, k_ref, None)
    proj(wv_ref, bv_ref, v_ref, None)


def qkv_projection(x, params, num_heads, scale):
    B, S, E = x.shape
    D = E // num_heads
    tm = _pick_seq_tile(S, _CFG["tm"])
    kernel = functools.partial(_qkv_kernel, scale=scale)

    x_spec = pl.BlockSpec((1, tm, E), lambda b, s: (b, s, 0))
    w_spec = pl.BlockSpec((E, E), lambda b, s: (0, 0))
    b_spec = pl.BlockSpec((1, E), lambda b, s: (0, 0))
    out_spec = pl.BlockSpec((1, num_heads, tm, D), lambda b, s: (b, 0, s, 0))
    out_sds = jax.ShapeDtypeStruct((B, num_heads, S, D), x.dtype)

    return pl.pallas_call(
        kernel,
        out_shape=(out_sds, out_sds, out_sds),
        grid=(B, S // tm),
        in_specs=[x_spec, w_spec, w_spec, w_spec, b_spec, b_spec, b_spec],
        out_specs=(out_spec, out_spec, out_spec),
        compiler_params=pltpu.CompilerParams(
            dimension_semantics=("parallel", "parallel"),
            vmem_limit_bytes=_CFG["vmem"]),
    )(x, params["q_w"], params["k_w"], params["v_w"],
      params["q_b"].reshape(1, E), params["k_b"].reshape(1, E),
      params["v_b"].reshape(1, E))


# ---------------------------------------------------------------------------
# Output projection fused with the head merge: consumes (B, H, S, D) directly
# and accumulates per-head (tm, D) @ (D, E) partial matmuls, so the attention
# output never takes an HBM transpose / reshape round trip.
# ---------------------------------------------------------------------------
def _out_proj_kernel(x_ref, w_ref, b_ref, o_ref):
    H = x_ref.shape[1]
    tm, E = o_ref.shape[1], o_ref.shape[2]
    acc = jnp.zeros((tm, E), jnp.float32)
    for h in range(H):                                 # static unroll over heads
        acc = acc + jnp.dot(x_ref[0, h], w_ref[h],
                            preferred_element_type=jnp.float32)
    o_ref[0] = (acc + b_ref[...]).astype(o_ref.dtype)


def out_projection(x_bhsd, w, b):
    B, H, S, D = x_bhsd.shape
    E_out = w.shape[1]
    w_h = w.reshape(H, D, E_out)                       # free reshape (no transpose)
    tm = _pick_seq_tile(S, _CFG["tm"])
    return pl.pallas_call(
        _out_proj_kernel,
        out_shape=jax.ShapeDtypeStruct((B, S, E_out), x_bhsd.dtype),
        grid=(B, S // tm),
        in_specs=[
            pl.BlockSpec((1, H, tm, D), lambda b, s: (b, 0, s, 0)),
            pl.BlockSpec((H, D, E_out), lambda b, s: (0, 0, 0)),
            pl.BlockSpec((1, E_out), lambda b, s: (0, 0)),
        ],
        out_specs=pl.BlockSpec((1, tm, E_out), lambda b, s: (b, s, 0)),
        compiler_params=pltpu.CompilerParams(
            dimension_semantics=("parallel", "parallel"),
            vmem_limit_bytes=_CFG["vmem"]),
    )(x_bhsd, w_h, b.reshape(1, E_out))


# ---------------------------------------------------------------------------
# Flash-style attention (default path): online softmax over a tiled KV axis,
# the (S, S) score matrix never touches HBM.  q arrives pre-scaled.
# Grid = (B, H//hb, S//Tq, S//Tk); the KV axis is the trailing reduction axis.
# ---------------------------------------------------------------------------
def _flash_attn_kernel(q_ref, k_ref, v_ref, o_ref, m_sc, l_sc, acc_sc):
    ki = pl.program_id(3)

    @pl.when(ki == 0)
    def _():
        m_sc[...] = jnp.full_like(m_sc, -jnp.inf)
        l_sc[...] = jnp.zeros_like(l_sc)
        acc_sc[...] = jnp.zeros_like(acc_sc)

    q = q_ref[0]                                       # (hb, Tq, D), pre-scaled
    k = k_ref[0]                                       # (hb, Tk, D)
    v = v_ref[0]                                       # (hb, Tk, D)

    # QK^T contracting last dims (no explicit transpose), f32 accumulation.
    s = jnp.einsum("hqd,hkd->hqk", q, k, preferred_element_type=jnp.float32)

    m_prev = m_sc[...]
    m_new = jnp.maximum(m_prev, jnp.max(s, axis=-1, keepdims=True))
    alpha = jnp.exp(m_prev - m_new)
    p = jnp.exp(s - m_new)
    l_sc[...] = alpha * l_sc[...] + jnp.sum(p, axis=-1, keepdims=True)
    acc_sc[...] = alpha * acc_sc[...] + jnp.einsum(
        "hqk,hkd->hqd", p.astype(v.dtype), v, preferred_element_type=jnp.float32)
    m_sc[...] = m_new

    @pl.when(ki == pl.num_programs(3) - 1)
    def _():
        o_ref[0] = (acc_sc[...] * _fast_recip(l_sc[...])).astype(o_ref.dtype)


def flash_attention(q, k, v):
    B, H, S, D = q.shape
    hb = _pick_div(H, _CFG["hb"])
    tq = _pick_seq_tile(S, _CFG["tq"])
    tk = _pick_seq_tile(S, _CFG["tk"])
    return pl.pallas_call(
        _flash_attn_kernel,
        out_shape=jax.ShapeDtypeStruct((B, H, S, D), q.dtype),
        grid=(B, H // hb, S // tq, S // tk),
        in_specs=[
            pl.BlockSpec((1, hb, tq, D), lambda b, h, qi, ki: (b, h, qi, 0)),
            pl.BlockSpec((1, hb, tk, D), lambda b, h, qi, ki: (b, h, ki, 0)),
            pl.BlockSpec((1, hb, tk, D), lambda b, h, qi, ki: (b, h, ki, 0)),
        ],
        out_specs=pl.BlockSpec((1, hb, tq, D),
                               lambda b, h, qi, ki: (b, h, qi, 0)),
        scratch_shapes=[
            pltpu.VMEM((hb, tq, 1), jnp.float32),      # running max
            pltpu.VMEM((hb, tq, 1), jnp.float32),      # running denom
            pltpu.VMEM((hb, tq, D), jnp.float32),      # output accumulator
        ],
        compiler_params=pltpu.CompilerParams(
            dimension_semantics=("parallel", "parallel", "parallel", "arbitrary"),
            vmem_limit_bytes=_CFG["vmem"]),
    )(q, k, v)


# ---------------------------------------------------------------------------
# Attention that also materializes attn_weights (only when the caller asks).
# One head per step and a modest query tile keep the full-S score tile and the
# (tq, S) weights output block inside VMEM for realistic S.
# ---------------------------------------------------------------------------
def _attn_weights_kernel(q_ref, k_ref, v_ref, o_ref, w_ref):
    q = q_ref[0, 0]                                    # (Tq, D), pre-scaled
    k = k_ref[0, 0]                                    # (S, D)
    v = v_ref[0, 0]                                    # (S, D)
    s = jnp.einsum("qd,kd->qk", q, k, preferred_element_type=jnp.float32)
    m = jnp.max(s, axis=-1, keepdims=True)
    e = jnp.exp(s - m)
    p = e * _fast_recip(jnp.sum(e, axis=-1, keepdims=True))
    # dropout p == 0.0 (module default / eval mode) -> identity, nothing emitted
    w_ref[0, 0] = p.astype(w_ref.dtype)
    o_ref[0, 0] = jnp.einsum("qk,kd->qd", p.astype(v.dtype), v,
                             preferred_element_type=jnp.float32).astype(o_ref.dtype)


def attention_with_weights(q, k, v):
    B, H, S, D = q.shape
    tq = _pick_seq_tile(S, 256)
    return pl.pallas_call(
        _attn_weights_kernel,
        out_shape=(
            jax.ShapeDtypeStruct((B, H, S, D), q.dtype),
            jax.ShapeDtypeStruct((B, H, S, S), q.dtype),
        ),
        grid=(B, H, S // tq),
        in_specs=[
            pl.BlockSpec((1, 1, tq, D), lambda b, h, qi: (b, h, qi, 0)),
            pl.BlockSpec((1, 1, S, D), lambda b, h, qi: (b, h, 0, 0)),
            pl.BlockSpec((1, 1, S, D), lambda b, h, qi: (b, h, 0, 0)),
        ],
        out_specs=(
            pl.BlockSpec((1, 1, tq, D), lambda b, h, qi: (b, h, qi, 0)),
            pl.BlockSpec((1, 1, tq, S), lambda b, h, qi: (b, h, qi, 0)),
        ),
        compiler_params=pltpu.CompilerParams(
            dimension_semantics=("parallel", "parallel", "parallel"),
            vmem_limit_bytes=_CFG["vmem"]),
    )(q, k, v)


# ---------------------------------------------------------------------------
# Full SiglipAttention forward.
# ---------------------------------------------------------------------------
def siglip_attention(hidden_states, params, num_heads, return_weights=False):
    B, S, E = hidden_states.shape
    head_dim = E // num_heads
    scale = head_dim ** (-0.5)

    # q comes out pre-scaled and already in (B, H, S, D); no XLA transposes.
    q, k, v = qkv_projection(hidden_states, params, num_heads, scale)

    if return_weights:
        attn_out, attn_weights = attention_with_weights(q, k, v)
    else:
        attn_out = flash_attention(q, k, v)
        attn_weights = None

    out = out_projection(attn_out, params["o_w"], params["o_b"])
    return out, attn_weights


# ---------------------------------------------------------------------------
# Pure-JAX reference for verification.
# ---------------------------------------------------------------------------
def reference(hidden_states, params, num_heads):
    B, S, E = hidden_states.shape
    D = E // num_heads
    scale = D ** (-0.5)
    q = hidden_states @ params["q_w"] + params["q_b"]
    k = hidden_states @ params["k_w"] + params["k_b"]
    v = hidden_states @ params["v_w"] + params["v_b"]
    q = q.reshape(B, S, num_heads, D).transpose(0, 2, 1, 3)
    k = k.reshape(B, S, num_heads, D).transpose(0, 2, 1, 3)
    v = v.reshape(B, S, num_heads, D).transpose(0, 2, 1, 3)
    s = jnp.einsum("bhqd,bhkd->bhqk", q, k) * scale
    p = jax.nn.softmax(s.astype(jnp.float32), axis=-1).astype(q.dtype)
    o = jnp.einsum("bhqk,bhkd->bhqd", p, v)
    o = o.transpose(0, 2, 1, 3).reshape(B, S, E)
    o = o @ params["o_w"] + params["o_b"]
    return o, p


def _make_params(key, E, dtype=jnp.float32):
    ks = jax.random.split(key, 8)
    # nn.Linear weights are (out, in); we store the transpose (in, out) directly.
    return {
        "q_w": jax.random.normal(ks[0], (E, E), jnp.float32).astype(dtype) * 0.05,
        "q_b": jax.random.normal(ks[1], (E,), jnp.float32).astype(dtype) * 0.05,
        "k_w": jax.random.normal(ks[2], (E, E), jnp.float32).astype(dtype) * 0.05,
        "k_b": jax.random.normal(ks[3], (E,), jnp.float32).astype(dtype) * 0.05,
        "v_w": jax.random.normal(ks[4], (E, E), jnp.float32).astype(dtype) * 0.05,
        "v_b": jax.random.normal(ks[5], (E,), jnp.float32).astype(dtype) * 0.05,
        "o_w": jax.random.normal(ks[6], (E, E), jnp.float32).astype(dtype) * 0.05,
        "o_b": jax.random.normal(ks[7], (E,), jnp.float32).astype(dtype) * 0.05,
    }


if __name__ == "__main__":
    # --- Small, module-consistent shapes: hidden_size=32, num_heads=4 -> head_dim=8
    B, S, E, H = 2, 8, 32, 4
    key = jax.random.PRNGKey(0)
    kx, kp = jax.random.split(key)
    hidden_states = jax.random.normal(kx, (B, S, E), dtype=jnp.float32)
    params = _make_params(kp, E)

    ref_out, ref_w = reference(hidden_states, params, H)

    # Fast path (no attn_weights materialized): flash-style attention.
    out_flash, w_none = siglip_attention(hidden_states, params, H,
                                         return_weights=False)
    out_flash = jax.block_until_ready(out_flash)
    assert w_none is None
    assert out_flash.shape == (B, S, E)
    assert jnp.allclose(out_flash, ref_out, atol=5e-4, rtol=5e-4)

    # Full-fidelity path (module also returns attn_weights).
    out_w, weights = siglip_attention(hidden_states, params, H,
                                      return_weights=True)
    out_w, weights = jax.block_until_ready((out_w, weights))
    assert out_w.shape == (B, S, E) and weights.shape == (B, H, S, S)
    assert jnp.allclose(out_w, ref_out, atol=5e-4, rtol=5e-4)
    assert jnp.allclose(weights, ref_w, atol=5e-4, rtol=5e-4)

    # --- bf16, multi-tile shapes: exercises the online-softmax KV tiling and the
    #     per-head split/merge at a head_dim different from the first test.
    B2, S2, E2, H2 = 1, 1024, 128, 8
    k2x, k2p = jax.random.split(jax.random.PRNGKey(1))
    hs2_bf16 = jax.random.normal(k2x, (B2, S2, E2), jnp.float32).astype(jnp.bfloat16)
    p2_bf16 = {k: v.astype(jnp.bfloat16) for k, v in _make_params(k2p, E2).items()}

    ref2, _ = reference(hs2_bf16.astype(jnp.float32),
                        {k: v.astype(jnp.float32) for k, v in p2_bf16.items()}, H2)
    out2, _ = siglip_attention(hs2_bf16, p2_bf16, H2, return_weights=False)
    out2 = jax.block_until_ready(out2)
    assert out2.shape == (B2, S2, E2)
    assert jnp.allclose(out2.astype(jnp.float32), ref2, atol=3e-2, rtol=3e-2)

    print("KERNEL_OK")
</pallas_src>

<mosaic_0001>
module attributes {stable_mosaic.version = 11 : i64} {
  func.func @_qkv_kernel(%arg0: i32, %arg1: i32, %arg2: memref<1x8x32xf32, #tpu.memory_space<vmem>>, %arg3: memref<32x32xf32, #tpu.memory_space<vmem>>, %arg4: memref<32x32xf32, #tpu.memory_space<vmem>>, %arg5: memref<32x32xf32, #tpu.memory_space<vmem>>, %arg6: memref<1x32xf32, #tpu.memory_space<vmem>>, %arg7: memref<1x32xf32, #tpu.memory_space<vmem>>, %arg8: memref<1x32xf32, #tpu.memory_space<vmem>>, %arg9: memref<1x4x8x8xf32, #tpu.memory_space<vmem>>, %arg10: memref<1x4x8x8xf32, #tpu.memory_space<vmem>>, %arg11: memref<1x4x8x8xf32, #tpu.memory_space<vmem>>) attributes {dimension_semantics = [#tpu.dimension_semantics<parallel>, #tpu.dimension_semantics<parallel>], iteration_bounds = array<i64: 2, 1>, scalar_prefetch = 0 : i64, scratch_operands = 0 : i64, tpu.core_type = #tpu.core_type<tc>, window_params = [{transform_indices = @transform_0, window_bounds = array<i64: 1, 8, 32>}, {pipeline_mode = #tpu.pipeline_mode<synchronous>, transform_indices = @transform_1, window_bounds = array<i64: 32, 32>}, {pipeline_mode = #tpu.pipeline_mode<synchronous>, transform_indices = @transform_2, window_bounds = array<i64: 32, 32>}, {pipeline_mode = #tpu.pipeline_mode<synchronous>, transform_indices = @transform_3, window_bounds = array<i64: 32, 32>}, {pipeline_mode = #tpu.pipeline_mode<synchronous>, transform_indices = @transform_4, window_bounds = array<i64: 1, 32>}, {pipeline_mode = #tpu.pipeline_mode<synchronous>, transform_indices = @transform_5, window_bounds = array<i64: 1, 32>}, {pipeline_mode = #tpu.pipeline_mode<synchronous>, transform_indices = @transform_6, window_bounds = array<i64: 1, 32>}, {transform_indices = @transform_7, window_bounds = array<i64: 1, 4, 8, 8>}, {transform_indices = @transform_8, window_bounds = array<i64: 1, 4, 8, 8>}, {transform_indices = @transform_9, window_bounds = array<i64: 1, 4, 8, 8>}]} {
    %c0 = arith.constant 0 : index
    %c0_0 = arith.constant 0 : index
    %c0_1 = arith.constant 0 : index
    %0 = vector.load %arg2[%c0, %c0_0, %c0_1] : memref<1x8x32xf32, #tpu.memory_space<vmem>>, vector<1x8x32xf32>
    %1 = vector.shape_cast %0 : vector<1x8x32xf32> to vector<8x32xf32>
    %c0_2 = arith.constant 0 : index
    %c0_3 = arith.constant 0 : index
    %2 = vector.load %arg3[%c0_2, %c0_3] : memref<32x32xf32, #tpu.memory_space<vmem>>, vector<32x32xf32>
    %cst = arith.constant dense<0.000000e+00> : vector<8x32xf32>
    %3 = tpu.matmul %1, %2, %cst {dimension_numbers = #tpu.dot_dimension_numbers<[1], [0], [0], [1], [0, 0, 1, 1], [], []>} : vector<8x32xf32>, vector<32x32xf32>, vector<8x32xf32> -> vector<8x32xf32>
    %c0_4 = arith.constant 0 : index
    %c0_5 = arith.constant 0 : index
    %4 = vector.load %arg6[%c0_4, %c0_5] : memref<1x32xf32, #tpu.memory_space<vmem>>, vector<1x32xf32>
    %5 = vector.broadcast %4 : vector<1x32xf32> to vector<8x32xf32>
    %6 = arith.addf %3, %5 : vector<8x32xf32>
    %cst_6 = arith.constant 0.353553385 : f32
    %7 = vector.broadcast %cst_6 : f32 to vector<8x32xf32>
    %8 = arith.mulf %6, %7 : vector<8x32xf32>
    %9 = vector.extract_strided_slice %8 {offsets = [0, 0], sizes = [8, 8], strides = [1, 1]} : vector<8x32xf32> to vector<8x8xf32>
    %c0_7 = arith.constant 0 : index
    %c0_8 = arith.constant 0 : index
    %c0_9 = arith.constant 0 : index
    %c0_10 = arith.constant 0 : index
    %10 = vector.load %arg9[%c0_7, %c0_8, %c0_9, %c0_10] : memref<1x4x8x8xf32, #tpu.memory_space<vmem>>, vector<1x1x8x8xf32>
    %11 = vector.shape_cast %10 : vector<1x1x8x8xf32> to vector<8x8xf32>
    %12 = vector.shape_cast %9 : vector<8x8xf32> to vector<1x1x8x8xf32>
    tpu.vector_store %arg9[%c0_7, %c0_8, %c0_9, %c0_10], %12 {strides = array<i32>} : memref<1x4x8x8xf32, #tpu.memory_space<vmem>>, vector<1x1x8x8xf32>,
    %13 = vector.extract_strided_slice %8 {offsets = [0, 8], sizes = [8, 8], strides = [1, 1]} : vector<8x32xf32> to vector<8x8xf32>
    %c0_11 = arith.constant 0 : index
    %c1 = arith.constant 1 : index
    %c0_12 = arith.constant 0 : index
    %c0_13 = arith.constant 0 : index
    %14 = vector.load %arg9[%c0_11, %c1, %c0_12, %c0_13] : memref<1x4x8x8xf32, #tpu.memory_space<vmem>>, vector<1x1x8x8xf32>
    %15 = vector.shape_cast %14 : vector<1x1x8x8xf32> to vector<8x8xf32>
    %16 = vector.shape_cast %13 : vector<8x8xf32> to vector<1x1x8x8xf32>
    tpu.vector_store %arg9[%c0_11, %c1, %c0_12, %c0_13], %16 {strides = array<i32>} : memref<1x4x8x8xf32, #tpu.memory_space<vmem>>, vector<1x1x8x8xf32>,
    %17 = vector.extract_strided_slice %8 {offsets = [0, 16], sizes = [8, 8], strides = [1, 1]} : vector<8x32xf32> to vector<8x8xf32>
    %c0_14 = arith.constant 0 : index
    %c2 = arith.constant 2 : index
    %c0_15 = arith.constant 0 : index
    %c0_16 = arith.constant 0 : index
    %18 = vector.load %arg9[%c0_14, %c2, %c0_15, %c0_16] : memref<1x4x8x8xf32, #tpu.memory_space<vmem>>, vector<1x1x8x8xf32>
    %19 = vector.shape_cast %18 : vector<1x1x8x8xf32> to vector<8x8xf32>
    %20 = vector.shape_cast %17 : vector<8x8xf32> to vector<1x1x8x8xf32>
    tpu.vector_store %arg9[%c0_14, %c2, %c0_15, %c0_16], %20 {strides = array<i32>} : memref<1x4x8x8xf32, #tpu.memory_space<vmem>>, vector<1x1x8x8xf32>,
    %21 = vector.extract_strided_slice %8 {offsets = [0, 24], sizes = [8, 8], strides = [1, 1]} : vector<8x32xf32> to vector<8x8xf32>
    %c0_17 = arith.constant 0 : index
    %c3 = arith.constant 3 : index
    %c0_18 = arith.constant 0 : index
    %c0_19 = arith.constant 0 : index
    %22 = vector.load %arg9[%c0_17, %c3, %c0_18, %c0_19] : memref<1x4x8x8xf32, #tpu.memory_space<vmem>>, vector<1x1x8x8xf32>
    %23 = vector.shape_cast %22 : vector<1x1x8x8xf32> to vector<8x8xf32>
    %24 = vector.shape_cast %21 : vector<8x8xf32> to vector<1x1x8x8xf32>
    tpu.vector_store %arg9[%c0_17, %c3, %c0_18, %c0_19], %24 {strides = array<i32>} : memref<1x4x8x8xf32, #tpu.memory_space<vmem>>, vector<1x1x8x8xf32>,
    %c0_20 = arith.constant 0 : index
    %c0_21 = arith.constant 0 : index
    %25 = vector.load %arg4[%c0_20, %c0_21] : memref<32x32xf32, #tpu.memory_space<vmem>>, vector<32x32xf32>
    %cst_22 = arith.constant dense<0.000000e+00> : vector<8x32xf32>
    %26 = tpu.matmul %1, %25, %cst_22 {dimension_numbers = #tpu.dot_dimension_numbers<[1], [0], [0], [1], [0, 0, 1, 1], [], []>} : vector<8x32xf32>, vector<32x32xf32>, vector<8x32xf32> -> vector<8x32xf32>
    %c0_23 = arith.constant 0 : index
    %c0_24 = arith.constant 0 : index
    %27 = vector.load %arg7[%c0_23, %c0_24] : memref<1x32xf32, #tpu.memory_space<vmem>>, vector<1x32xf32>
    %28 = vector.broadcast %27 : vector<1x32xf32> to vector<8x32xf32>
    %29 = arith.addf %26, %28 : vector<8x32xf32>
    %30 = vector.extract_strided_slice %29 {offsets = [0, 0], sizes = [8, 8], strides = [1, 1]} : vector<8x32xf32> to vector<8x8xf32>
    %c0_25 = arith.constant 0 : index
    %c0_26 = arith.constant 0 : index
    %c0_27 = arith.constant 0 : index
    %c0_28 = arith.constant 0 : index
    %31 = vector.load %arg10[%c0_25, %c0_26, %c0_27, %c0_28] : memref<1x4x8x8xf32, #tpu.memory_space<vmem>>, vector<1x1x8x8xf32>
    %32 = vector.shape_cast %31 : vector<1x1x8x8xf32> to vector<8x8xf32>
    %33 = vector.shape_cast %30 : vector<8x8xf32> to vector<1x1x8x8xf32>
    tpu.vector_store %arg10[%c0_25, %c0_26, %c0_27, %c0_28], %33 {strides = array<i32>} : memref<1x4x8x8xf32, #tpu.memory_space<vmem>>, vector<1x1x8x8xf32>,
    %34 = vector.extract_strided_slice %29 {offsets = [0, 8], sizes = [8, 8], strides = [1, 1]} : vector<8x32xf32> to vector<8x8xf32>
    %c0_29 = arith.constant 0 : index
    %c1_30 = arith.constant 1 : index
    %c0_31 = arith.constant 0 : index
    %c0_32 = arith.constant 0 : index
    %35 = vector.load %arg10[%c0_29, %c1_30, %c0_31, %c0_32] : memref<1x4x8x8xf32, #tpu.memory_space<vmem>>, vector<1x1x8x8xf32>
    %36 = vector.shape_cast %35 : vector<1x1x8x8xf32> to vector<8x8xf32>
    %37 = vector.shape_cast %34 : vector<8x8xf32> to vector<1x1x8x8xf32>
    tpu.vector_store %arg10[%c0_29, %c1_30, %c0_31, %c0_32], %37 {strides = array<i32>} : memref<1x4x8x8xf32, #tpu.memory_space<vmem>>, vector<1x1x8x8xf32>,
    %38 = vector.extract_strided_slice %29 {offsets = [0, 16], sizes = [8, 8], strides = [1, 1]} : vector<8x32xf32> to vector<8x8xf32>
    %c0_33 = arith.constant 0 : index
    %c2_34 = arith.constant 2 : index
    %c0_35 = arith.constant 0 : index
    %c0_36 = arith.constant 0 : index
    %39 = vector.load %arg10[%c0_33, %c2_34, %c0_35, %c0_36] : memref<1x4x8x8xf32, #tpu.memory_space<vmem>>, vector<1x1x8x8xf32>
    %40 = vector.shape_cast %39 : vector<1x1x8x8xf32> to vector<8x8xf32>
    %41 = vector.shape_cast %38 : vector<8x8xf32> to vector<1x1x8x8xf32>
    tpu.vector_store %arg10[%c0_33, %c2_34, %c0_35, %c0_36], %41 {strides = array<i32>} : memref<1x4x8x8xf32, #tpu.memory_space<vmem>>, vector<1x1x8x8xf32>,
    %42 = vector.extract_strided_slice %29 {offsets = [0, 24], sizes = [8, 8], strides = [1, 1]} : vector<8x32xf32> to vector<8x8xf32>
    %c0_37 = arith.constant 0 : index
    %c3_38 = arith.constant 3 : index
    %c0_39 = arith.constant 0 : index
    %c0_40 = arith.constant 0 : index
    %43 = vector.load %arg10[%c0_37, %c3_38, %c0_39, %c0_40] : memref<1x4x8x8xf32, #tpu.memory_space<vmem>>, vector<1x1x8x8xf32>
    %44 = vector.shape_cast %43 : vector<1x1x8x8xf32> to vector<8x8xf32>
    %45 = vector.shape_cast %42 : vector<8x8xf32> to vector<1x1x8x8xf32>
    tpu.vector_store %arg10[%c0_37, %c3_38, %c0_39, %c0_40], %45 {strides = array<i32>} : memref<1x4x8x8xf32, #tpu.memory_space<vmem>>, vector<1x1x8x8xf32>,
    %c0_41 = arith.constant 0 : index
    %c0_42 = arith.constant 0 : index
    %46 = vector.load %arg5[%c0_41, %c0_42] : memref<32x32xf32, #tpu.memory_space<vmem>>, vector<32x32xf32>
    %cst_43 = arith.constant dense<0.000000e+00> : vector<8x32xf32>
    %47 = tpu.matmul %1, %46, %cst_43 {dimension_numbers = #tpu.dot_dimension_numbers<[1], [0], [0], [1], [0, 0, 1, 1], [], []>} : vector<8x32xf32>, vector<32x32xf32>, vector<8x32xf32> -> vector<8x32xf32>
    %c0_44 = arith.constant 0 : index
    %c0_45 = arith.constant 0 : index
    %48 = vector.load %arg8[%c0_44, %c0_45] : memref<1x32xf32, #tpu.memory_space<vmem>>, vector<1x32xf32>
    %49 = vector.broadcast %48 : vector<1x32xf32> to vector<8x32xf32>
    %50 = arith.addf %47, %49 : vector<8x32xf32>
    %51 = vector.extract_strided_slice %50 {offsets = [0, 0], sizes = [8, 8], strides = [1, 1]} : vector<8x32xf32> to vector<8x8xf32>
    %c0_46 = arith.constant 0 : index
    %c0_47 = arith.constant 0 : index
    %c0_48 = arith.constant 0 : index
    %c0_49 = arith.constant 0 : index
    %52 = vector.load %arg11[%c0_46, %c0_47, %c0_48, %c0_49] : memref<1x4x8x8xf32, #tpu.memory_space<vmem>>, vector<1x1x8x8xf32>
    %53 = vector.shape_cast %52 : vector<1x1x8x8xf32> to vector<8x8xf32>
    %54 = vector.shape_cast %51 : vector<8x8xf32> to vector<1x1x8x8xf32>
    tpu.vector_store %arg11[%c0_46, %c0_47, %c0_48, %c0_49], %54 {strides = array<i32>} : memref<1x4x8x8xf32, #tpu.memory_space<vmem>>, vector<1x1x8x8xf32>,
    %55 = vector.extract_strided_slice %50 {offsets = [0, 8], sizes = [8, 8], strides = [1, 1]} : vector<8x32xf32> to vector<8x8xf32>
    %c0_50 = arith.constant 0 : index
    %c1_51 = arith.constant 1 : index
    %c0_52 = arith.constant 0 : index
    %c0_53 = arith.constant 0 : index
    %56 = vector.load %arg11[%c0_50, %c1_51, %c0_52, %c0_53] : memref<1x4x8x8xf32, #tpu.memory_space<vmem>>, vector<1x1x8x8xf32>
    %57 = vector.shape_cast %56 : vector<1x1x8x8xf32> to vector<8x8xf32>
    %58 = vector.shape_cast %55 : vector<8x8xf32> to vector<1x1x8x8xf32>
    tpu.vector_store %arg11[%c0_50, %c1_51, %c0_52, %c0_53], %58 {strides = array<i32>} : memref<1x4x8x8xf32, #tpu.memory_space<vmem>>, vector<1x1x8x8xf32>,
    %59 = vector.extract_strided_slice %50 {offsets = [0, 16], sizes = [8, 8], strides = [1, 1]} : vector<8x32xf32> to vector<8x8xf32>
    %c0_54 = arith.constant 0 : index
    %c2_55 = arith.constant 2 : index
    %c0_56 = arith.constant 0 : index
    %c0_57 = arith.constant 0 : index
    %60 = vector.load %arg11[%c0_54, %c2_55, %c0_56, %c0_57] : memref<1x4x8x8xf32, #tpu.memory_space<vmem>>, vector<1x1x8x8xf32>
    %61 = vector.shape_cast %60 : vector<1x1x8x8xf32> to vector<8x8xf32>
    %62 = vector.shape_cast %59 : vector<8x8xf32> to vector<1x1x8x8xf32>
    tpu.vector_store %arg11[%c0_54, %c2_55, %c0_56, %c0_57], %62 {strides = array<i32>} : memref<1x4x8x8xf32, #tpu.memory_space<vmem>>, vector<1x1x8x8xf32>,
    %63 = vector.extract_strided_slice %50 {offsets = [0, 24], sizes = [8, 8], strides = [1, 1]} : vector<8x32xf32> to vector<8x8xf32>
    %c0_58 = arith.constant 0 : index
    %c3_59 = arith.constant 3 : index
    %c0_60 = arith.constant 0 : index
    %c0_61 = arith.constant 0 : index
    %64 = vector.load %arg11[%c0_58, %c3_59, %c0_60, %c0_61] : memref<1x4x8x8xf32, #tpu.memory_space<vmem>>, vector<1x1x8x8xf32>
    %65 = vector.shape_cast %64 : vector<1x1x8x8xf32> to vector<8x8xf32>
    %66 = vector.shape_cast %63 : vector<8x8xf32> to vector<1x1x8x8xf32>
    tpu.vector_store %arg11[%c0_58, %c3_59, %c0_60, %c0_61], %66 {strides = array<i32>} : memref<1x4x8x8xf32, #tpu.memory_space<vmem>>, vector<1x1x8x8xf32>,
    return
  }
  func.func @transform_0(%arg0: i32, %arg1: i32) -> (i32, i32, i32) {
    %c0_i32 = arith.constant 0 : i32
    %c0_i32_0 = arith.constant 0 : i32
    return %arg0, %arg1, %c0_i32 : i32, i32, i32
  }
  func.func @transform_1(%arg0: i32, %arg1: i32) -> (i32, i32) {
    %c0_i32 = arith.constant 0 : i32
    %c0_i32_0 = arith.constant 0 : i32
    %c0_i32_1 = arith.constant 0 : i32
    return %c0_i32, %c0_i32_0 : i32, i32
  }
  func.func @transform_2(%arg0: i32, %arg1: i32) -> (i32, i32) {
    %c0_i32 = arith.constant 0 : i32
    %c0_i32_0 = arith.constant 0 : i32
    %c0_i32_1 = arith.constant 0 : i32
    return %c0_i32, %c0_i32_0 : i32, i32
  }
  func.func @transform_3(%arg0: i32, %arg1: i32) -> (i32, i32) {
    %c0_i32 = arith.constant 0 : i32
    %c0_i32_0 = arith.constant 0 : i32
    %c0_i32_1 = arith.constant 0 : i32
    return %c0_i32, %c0_i32_0 : i32, i32
  }
  func.func @transform_4(%arg0: i32, %arg1: i32) -> (i32, i32) {
    %c0_i32 = arith.constant 0 : i32
    %c0_i32_0 = arith.constant 0 : i32
    %c0_i32_1 = arith.constant 0 : i32
    return %c0_i32, %c0_i32_0 : i32, i32
  }
  func.func @transform_5(%arg0: i32, %arg1: i32) -> (i32, i32) {
    %c0_i32 = arith.constant 0 : i32
    %c0_i32_0 = arith.constant 0 : i32
    %c0_i32_1 = arith.constant 0 : i32
    return %c0_i32, %c0_i32_0 : i32, i32
  }
  func.func @transform_6(%arg0: i32, %arg1: i32) -> (i32, i32) {
    %c0_i32 = arith.constant 0 : i32
    %c0_i32_0 = arith.constant 0 : i32
    %c0_i32_1 = arith.constant 0 : i32
    return %c0_i32, %c0_i32_0 : i32, i32
  }
  func.func @transform_7(%arg0: i32, %arg1: i32) -> (i32, i32, i32, i32) {
    %c0_i32 = arith.constant 0 : i32
    %c0_i32_0 = arith.constant 0 : i32
    %c0_i32_1 = arith.constant 0 : i32
    return %arg0, %c0_i32, %arg1, %c0_i32_0 : i32, i32, i32, i32
  }
  func.func @transform_8(%arg0: i32, %arg1: i32) -> (i32, i32, i32, i32) {
    %c0_i32 = arith.constant 0 : i32
    %c0_i32_0 = arith.constant 0 : i32
    %c0_i32_1 = arith.constant 0 : i32
    return %arg0, %c0_i32, %arg1, %c0_i32_0 : i32, i32, i32, i32
  }
  func.func @transform_9(%arg0: i32, %arg1: i32) -> (i32, i32, i32, i32) {
    %c0_i32 = arith.constant 0 : i32
    %c0_i32_0 = arith.constant 0 : i32
    %c0_i32_1 = arith.constant 0 : i32
    return %arg0, %c0_i32, %arg1, %c0_i32_0 : i32, i32, i32, i32
  }
}

</mosaic_0001>

<bundles_post_ra>
// kernel: tpu_custom_call.1
= control target key start
LH: loop header
LB: loop body
LE: loop exit
PB: predicated region body
PF: predicated region fallthrough
CT: control target
= control target key end

     0   :  { %s1585_s0 = inlined_call_operand.hbm [shape: f32[2,8,32], index: 0, kind: input, shape index: {}]   ;;  %s1586_s1 = inlined_call_operand.hbm [shape: f32[32,32], index: 1, kind: input, shape index: {}]   ;;  %s1587_s2 = inlined_call_operand.hbm [shape: f32[32,32], index: 2, kind: input, shape index: {}]   ;;  %s1588_s3 = inlined_call_operand.hbm [shape: f32[32,32], index: 3, kind: input, shape index: {}]   ;;  %s1589_s4 = inlined_call_operand.vmem [shape: f32[1,32], index: 4, kind: input, shape index: {}]   ;;  %s1590_s5 = inlined_call_operand.vmem [shape: f32[1,32], index: 5, kind: input, shape index: {}]   ;;  %s1591_s6 = inlined_call_operand.vmem [shape: f32[1,32], index: 6, kind: input, shape index: {}]   ;;  %s1592_s7 = inlined_call_operand.hbm [shape: f32[2,4,8,8], index: 7, kind: output, shape index: {0}]   ;;  %s1593_s8 = inlined_call_operand.hbm [shape: f32[2,4,8,8], index: 8, kind: output, shape index: {1}]   ;;  %s1594_s9 = inlined_call_operand.hbm [shape: f32[2,4,8,8], index: 9, kind: output, shape index: {2}]  }
   0x1   :  { %1599 = sst [smem:[#allocation21_spill]] %s1585_s0 }
   0x2   :  { %1600 = sst [smem:[#allocation22_spill]] %s1586_s1 }
   0x3   :  { %1601 = sst [smem:[#allocation23_spill]] %s1587_s2 }
   0x4   :  { %1602 = sst [smem:[#allocation24_spill]] %s1588_s3 }
   0x5   :  { %1603 = sst [smem:[#allocation25_spill]] %s1589_s4 }
   0x6   :  { %1604 = sst [smem:[#allocation26_spill]] %s1590_s5 }
   0x7   :  { %15 = vsyncpa [#allocation3], 0 }
   0x8   :  { %17 = vsyncpa [#allocation3 + $0x1], 0 }
   0x9   :  { %18 = vsyncpa [#allocation6], 0 }
   0xa   :  { %19 = vsyncpa [#allocation9], 0 }
   0xb   :  { %20 = vsyncpa [#allocation4], 0 }
   0xc   :  { %22 = vsyncpa [#allocation4 + $0x1], 0 }
   0xd   :  { %23 = vsyncpa [#allocation12], 0 }
   0xe   :  { %25 = vsyncpa [#allocation12 + $0x1], 0  ;;  %s1312_s30 = smov 0   ;;  %s1314_s10 = smov 0  }
   0xf   :  { %s1316_s11 = smov 0   ;;  %s1318_s12 = smov 0  }
  0x10   :  { %s1320_s13 = smov 0   ;;  %s1322_s14 = smov 0  }
  0x11 LB: > { %s1343_s15 = sadd.s32 4294967295, %s1250_s14   ;;  %p826_p0 = scmp.ge.s32.totalorder %s1250_s14, 1  ;;  %s1250_s14 = sphi %s1322_s14, %s31_s14   ;;  %s1246_s13 = sphi %s1320_s13, %s1629_s13   ;;  %s1242_s12 = sphi %s1318_s12, %s1628_s12   ;;  %s1238_s11 = sphi %s1316_s11, %s1627_s11   ;;  %s1234_s10 = sphi %s1314_s10, %s1626_s10   ;;  %s1230_s30 = sphi %s1312_s30, %s1625_s30  }
  0x12   : > { %p66_p1 = scmp.eq.s32.totalorder %s1343_s15, 0  ;;  %p286_p2 = scmp.lt.s32.totalorder %s1250_s14, 3 }
  0x13   : > { %s1605_s1 = sld [smem:[#allocation22_spill]]  ;;  %s1252_s20 = smov [#allocation5]  }
  0x14   : > { %p1351_p3 = pnand %p826_p0, %p286_p2  ;;  %s299_s21 = sshll.u32 %s1252_s20, 4  ;;  %s300_s21 = int_to_ptr.vmem [resolvable:$true] %s299_s21 }
  0x15   : > { %p830_p6 = scmp.ge.s32.totalorder %s1250_s14, 2  ;;  %s1608_s2 = sld [smem:[#allocation23_spill]] }
  0x16   : > { %p887_p4 = pneg %p1351_p3  ;;  %s1253_s26 = smov 128  }
  0x17   : > { %s1254_s27 = smov 8   ;;  %s1255_s28 = smov [#allocation7]  }
  0x18   : > { %p1359_p5 = pnand %p887_p4, %p66_p1  ;;  %s313_s29 = sshll.u32 %s1255_s28, 4  ;;  %s314_s29 = int_to_ptr.vmem [resolvable:$true] %s313_s29 }
  0x19   : > { %s297_s18 = sshll.u32 %s1605_s1, 4  ;;  %s1609_s3 = sld [smem:[#allocation24_spill]]  ;;  %s298_s18 = int_to_ptr.hbm [resolvable:$true] %s297_s18 }
  0x1a   : > { %890 = dma.hbm_to_vmem [thread:$0]  (!%p1359_p5), %s298_s18, 512, %s300_s21, [#allocation6], %s1253_s26, %s1253_s26, %s1254_s27  }
  0x1b   : > { %s311_s25 = sshll.u32 %s1608_s2, 4  ;;  %s1256_s23 = smov [#allocation8]   ;;  %s312_s25 = int_to_ptr.hbm [resolvable:$true] %s311_s25 }
  0x1c   : > { %893 = dma.hbm_to_vmem [thread:$0]  (!%p1359_p5), %s312_s25, 512, %s314_s29, [#allocation6], %s1253_s26, %s1253_s26, %s1254_s27  }
  0x1d   : > { %s327_s24 = sshll.u32 %s1256_s23, 4  ;;  %s1595_s18 = sadd.s32 4294967294, %s1250_s14   ;;  %s328_s24 = int_to_ptr.vmem [resolvable:$true] %s327_s24 }
  0x1e   : > { %s43_s21 = sadd.s32 1, %s1246_s13  ;;  %s52_s28 = sadd.s32 1, %s1238_s11 }
  0x1f   : > { %s325_s20 = sshll.u32 %s1609_s3, 4  ;;  %p45_p7 = scmp.ge.s32.totalorder %s43_s21, 2  ;;  %s326_s20 = int_to_ptr.hbm [resolvable:$true] %s325_s20 }
  0x20   : > { %896 = dma.hbm_to_vmem [thread:$0]  (!%p1359_p5), %s326_s20, 512, %s328_s24, [#allocation9], %s1253_s26, %s1253_s26, %s1254_s27  }
  0x21   : > { %p59_p8 = scmp.ne.s32.totalorder %s1238_s11, %s1234_s10  ;;  %p60_p9 = scmp.eq.s32.totalorder %s1250_s14, 0 }
  0x22   : > { %p65_p10 = scmp.ne.s32.totalorder %s1234_s10, %s1230_s30  ;;  %s1631_s21 = smov (%p45_p7, %s43_s21), 0 }
  0x23   : > { %1610 = sst [smem:[#allocation19_spill]] %s1631_s21  ;;  %p1386_p11 = por %p60_p9, %p59_p8 }
  0x24   : > { %p1392_p12 = por %p66_p1, %p65_p10  ;;  %s47_s26 = ssub.s32 %s1246_s13, %s1631_s21 }
  0x25   : > { %p217_p13 = scmp.eq.s32.totalorder %s1343_s15, 1  ;;  %p50_p0 = scmp.eq.s32.totalorder %s47_s26, 0 }
  0x26   : > { %p223_p2 = scmp.eq.s32.totalorder %s1595_s18, 1  ;;  %p914_p5 = scmp.lt.s32.totalorder %s1250_s14, 2 }
  0x27   : > { %p1401_p4 = por %p217_p13, %p59_p8  ;;  %s350_s17 = sand.u32 1, %s1238_s11  }
  0x28   : > { %s1407_s29 = scalar_select %p50_p0, %s1238_s11, %s52_s28  }
  0x29   : > { %p1409_p7 = por %p223_p2, %p65_p10  ;;  %s831_s20 = sshll.u32 %s350_s17, 3 }
  0x2a   : > { %s832_s23 = sshll.u32 %s1246_s13, 3  ;;  %s1615_s0 = sld [smem:[#allocation21_spill]] }
  0x2b   : > { %s354_s2 = scalar_lea.vmem [#allocation2], %s831_s20  ;;  %p898_p8 = pnand %p914_p5, %p1386_p11 }
  0x2c   : > { %s363_s18 = sshll.u32 %s354_s2, 4  ;;  %s351_s28 = scalar_lea.sflag [#allocation3], %s350_s17  ;;  %s364_s18 = int_to_ptr.vmem [resolvable:$true] %s363_s18 }
  0x2e   : > { %372 = sbr.rel (%p1351_p3) target bundleno = 361 (0x169), region = 48 }
  0x30   : > { %s359_s26 = scalar_lea.hbm %s1615_s0, %s832_s23 }
  0x31   : > { %s361_s3 = sshll.u32 %s359_s26, 4  ;;  %s362_s3 = int_to_ptr.hbm [resolvable:$true] %s361_s3 }
  0x32   : > { %900 = dma.hbm_to_vmem [thread:$0]  (!%p898_p8), %s362_s3, 128, %s364_s18, %s351_s28  }
  0x33   : > { %s1423_s21 = sand.u32 1, %s1234_s10  }
  0x34   : > { %s834_s1 = sshll.u32 %s1423_s21, 3  ;;  %s375_s23 = scalar_lea.sflag [#allocation3], %s1423_s21 }
  0x35   : > { %s378_s20 = scalar_lea.vmem [#allocation2], %s834_s1 }
  0x36   : > { %1209 = dma.done.wait (%p1392_p12), %s375_s23, 128  }
  0x37   : > { %1211 = vsyncadd (%p1392_p12), %s375_s23, 4294967168 }
  0x38   : > { %1213 = dma.done.wait (%p66_p1), [#allocation6], 1024  }
  0x39   : > { %1215 = vsyncadd (%p66_p1), [#allocation6], 4294966272 }
  0x3a   : > { %1217 = dma.done.wait (%p66_p1), [#allocation9], 512  }
  0x3b   : > { %1219 = vsyncadd (%p66_p1), [#allocation9], 4294966784  ;;  %v443_v0 = vld [vmem:[#allocation5 + $0x18] sm:$0xff]  ;;  %v442_v2 = vld [vmem:[#allocation5 + $0x10] sm:$0xff]  ;;  %vm448_vm0 = vcmask 261120   ;;  %s838_s2 = sshll.u32 %s1423_s21, 5 }
  0x3c   : > { %v494_v1 = vld [vmem:[#allocation7 + $0x18] sm:$0xff]  ;;  %464 = vmatpush.msra.mxu0 %v443_v0  ;;  %v493_v3 = vld [vmem:[#allocation7 + $0x10] sm:$0xff]  ;;  %v441_v4 = vld [vmem:[#allocation5 + $0x8] sm:$0xff]  ;;  %s1616_s4 = sld [smem:[#allocation25_spill]]  ;;  %vm473_vm1 = vcmask 64512   ;;  %s1446_s22 = scalar_lea.vmem [#allocation11], %s838_s2 }
  0x3d   : > { %511 = vmatpush.msra.mxu1 %v494_v1  ;;  %v492_v5 = vld [vmem:[#allocation7 + $0x8] sm:$0xff]  ;;  %v539_v6 = vld [vmem:[#allocation8 + $0x18] sm:$0xff]  ;;  %v538_v7 = vld [vmem:[#allocation8 + $0x10] sm:$0xff]  ;;  %s1617_s5 = sld [smem:[#allocation26_spill]]  ;;  %s1257_s17 = smov 104  }
  0x3e   : > { %465 = vmatpush.msra.mxu0 %v442_v2  ;;  %v440_v8 = vld [vmem:[#allocation5] sm:$0xff]  ;;  %556 = vmatpush.msra.mxu2 %v539_v6  ;;  %v439_v10 = vld [vmem:[%s378_s20] sm:$0xff]  ;;  %v537_v11 = vld [vmem:[#allocation8 + $0x8] sm:$0xff]  ;;  %s1258_s24 = smov 120   ;;  %s1450_s26 = scalar_lea.vmem [#allocation10], %s838_s2 }
  0x3f   : > { %512 = vmatpush.msra.mxu1 %v493_v3  ;;  %v491_v9 = vld [vmem:[#allocation7] sm:$0xff]  ;;  %s1259_s28 = smov 112   ;;  %v979_v20 = vld [vmem:[%s1591_s6] ss:$0 sm:$0xff]  ;;  %s1457_s20 = scalar_lea.vmem [#allocation13], %s838_s2 }
  0x40   : > { %466 = vmatpush.msra.mxu0 %v441_v4  ;;  %557 = vmatpush.msra.mxu2 %v538_v7  ;;  %v536_v12 = vld [vmem:[#allocation8] sm:$0xff]  ;;  %s1468_s2 = sshll.u32 %s1242_s12, 5  ;;  %s605_s3 = sshll.u32 %s1450_s26, 4  ;;  %s1485_s3 = int_to_ptr.vmem [resolvable:$true] %s605_s3 }
  0x41   : > { %513 = vmatpush.msra.mxu1 %v492_v5  ;;  %s622_s25 = scalar_lea.hbm %s1593_s8, %s1468_s2  ;;  %s586_s1 = sand.u32 1, %s1343_s15  }
  0x42   : > { %467 = vmatpush.msra.mxu0 %v440_v8  ;;  %558 = vmatpush.msra.mxu2 %v537_v11  ;;  %v977_v13 = vld [vmem:[%s1616_s4] ss:$0 sm:$0xff]  ;;  %s1487_s23 = sshll.u32 %s622_s25, 4  ;;  %s626_s23 = int_to_ptr.hbm [resolvable:$true] %s1487_s23 }
  0x43   : > { %514 = vmatpush.msra.mxu1 %v491_v9  ;;  %841 = vmatmul.msk.f32.vlgmr.msra.gmra.mxu0 %vm448_vm0, %v439_v10  ;;  %v978_v14 = vld [vmem:[%s1617_s5] ss:$0 sm:$0xff]  ;;  %s1114_s25 = sshra.s32 %s626_s23, 4  ;;  %s1115_s25 = int_to_ptr.hbm [resolvable:$true] %s1114_s25 }
  0x44   : > { %845 = vmatmul.msk.f32.vlgmr.msra.gmra.mxu1 %vm448_vm0, %v439_v10  ;;  %559 = vmatpush.msra.mxu2 %v536_v12  ;;  %s1116_s12 = scalar_lea.hbm %s1115_s25, 32  ;;  %p1121_p10 = scmp.lt.s32.totalorder %s1115_s25, %s1593_s8 }
  0x45   : > { %849 = vmatmul.msk.f32.vlgmr.msra.gmra.mxu2 %vm448_vm0, %v439_v10  ;;  %p1117_p1 = scmp.ne.s32.totalorder %s1115_s25, %s1116_s12 }
  0x47   : > { %p1118_p3 = pnand %p1117_p1, %p1401_p4 }
  0x49   : > { %p1119_p9 = pneg %p1118_p3 }
  0xc0   : > { %v469_v15 = vpop.f32.mrf.mxu0 }
  0xc1   : > { %v516_v16 = vpop.f32.mrf.mxu1  ;;  %v470_v17 = vadd.f32 %v977_v13, %v469_v15 }
  0xc2   : > { %v517_v18 = vadd.f32 %v978_v14, %v516_v16 }
  0xc3   : > { %v472_v19 = vmul.f32 0.35355338, %v470_v17 }
  0xc4   : > { %519 = vst.msk [vmem:[%s1446_s22] sm:$0xff] %vm473_vm1, %v517_v18  ;;  %531 = vrot.lane.b32.xlu1 %v517_v18, %s1257_s17  ;;  %521 = vrot.lane.b32.xlu0 %v517_v18, %s1258_s24 }
  0xc5   : > { %474 = vst.msk [vmem:[%s1450_s26] sm:$0xff] %vm473_vm1, %v472_v19  ;;  %481 = vrot.lane.b32.xlu2 %v472_v19, %s1259_s28 }
  0xc8   : > { %v561_v21 = vpop.f32.mrf.mxu2 }
  0xc9   : > { %v562_v22 = vadd.f32 %v979_v20, %v561_v21 }
  0xcb   : > { %564 = vst.msk [vmem:[%s1457_s20] sm:$0xff] %vm473_vm1, %v562_v22 }
  0xcc   : > { %526 = vrot.lane.b32.xlu0 %v517_v18, %s1259_s28  ;;  %476 = vrot.lane.b32.xlu1 %v472_v19, %s1258_s24 }
  0xcd   : > { %486 = vrot.lane.b32.xlu2 %v472_v19, %s1257_s17 }
  0xd4   : > { %566 = vrot.lane.b32.xlu0 %v562_v22, %s1258_s24  ;;  %571 = vrot.lane.b32.xlu1 %v562_v22, %s1259_s28  ;;  %s604_s28 = scalar_lea.hbm %s1592_s7, %s1468_s2  ;;  %s1501_s24 = scalar_lea.sflag [#allocation12], %s586_s1 }
  0xd5   : > { %576 = vrot.lane.b32.xlu2 %v562_v22, %s1257_s17  ;;  %s623_s17 = sshll.u32 %s1446_s22, 4  ;;  %s1489_s0 = sshll.u32 %s604_s28, 4  ;;  %s624_s17 = int_to_ptr.vmem [resolvable:$true] %s623_s17 }
  0xd6   : > { %1618 = sst [smem:[#allocation20_spill]] %s1489_s0 }
 0x11f   : > { %v482_v23 = vpop.permute.xlu2 %481 }
 0x120   : > { %843 = vst.msk [vmem:[%s1450_s26 + $0x10] sm:$0xff] %vm473_vm1, %v482_v23 }
 0x127   : > { %v487_v24 = vpop.permute.xlu2 %486 }
 0x128   : > { %844 = vst.msk [vmem:[%s1450_s26 + $0x18] sm:$0xff] %vm473_vm1, %v487_v24 }
 0x12f   : > { %v577_v25 = vpop.permute.xlu2 %576 }
 0x130   : > { %852 = vst.msk [vmem:[%s1457_s20 + $0x18] sm:$0xff] %vm473_vm1, %v577_v25 }
 0x136   : > { %v532_v26 = vpop.permute.xlu1 %531  ;;  %v522_v27 = vpop.permute.xlu0 %521 }
 0x137   : > { %848 = vst.msk [vmem:[%s1446_s22 + $0x18] sm:$0xff] %vm473_vm1, %v532_v26 }
 0x138   : > { %846 = vst.msk [vmem:[%s1446_s22 + $0x8] sm:$0xff] %vm473_vm1, %v522_v27 }
 0x13e   : > { %v527_v28 = vpop.permute.xlu0 %526  ;;  %v477_v29 = vpop.permute.xlu1 %476 }
 0x13f   : > { %847 = vst.msk [vmem:[%s1446_s22 + $0x10] sm:$0xff] %vm473_vm1, %v527_v28  ;;  %s1120_s22 = scalar_lea.hbm %s1593_s8, 64 }
 0x140   : > { %842 = vst.msk [vmem:[%s1450_s26 + $0x8] sm:$0xff] %vm473_vm1, %v477_v29  ;;  %p1122_p11 = scmp.lt.s32.totalorder %s1120_s22, %s1116_s12 }
 0x142   : > { %p1123_p12 = por %p1122_p11, %p1121_p10 }
 0x144   : > { %p1124_p13 = pnand %p1123_p12, %p1119_p9 }
 0x146   : > { %1127 = shalt.err (!%p1124_p13)
}
 0x147   : > { %s1260_s26 = smov 128   ;;  %s1619_s1 = sld [smem:[#allocation20_spill]] }
 0x148   : > { %s1261_s19 = smov 8   ;;  %s582_s4 = scalar_lea.sflag [#allocation4], %s1423_s21 }
 0x149   : > { %882 = dma.vmem_to_hbm [thread:$0]  (%p1401_p4), %s624_s17, 512, %s626_s23, %s1501_s24, %s1260_s26, %s1260_s26, %s1261_s19  }
 0x14a   : > { %s1148_s28 = scalar_lea.hbm %s1592_s7, 64 }
 0x14d   : > { %s1620_s15 = int_to_ptr.hbm [resolvable:$true] %s1619_s1 }
 0x14e   : > { %s1142_s0 = sshra.s32 %s1620_s15, 4  ;;  %s1143_s0 = int_to_ptr.hbm [resolvable:$true] %s1142_s0 }
 0x14f   : > { %s1144_s5 = scalar_lea.hbm %s1143_s0, 32  ;;  %p1149_p8 = scmp.lt.s32.totalorder %s1143_s0, %s1592_s7 }
 0x150   : > { %p1145_p0 = scmp.ne.s32.totalorder %s1143_s0, %s1144_s5  ;;  %p1150_p1 = scmp.lt.s32.totalorder %s1148_s28, %s1144_s5 }
 0x152   : > { %p1146_p2 = pnand %p1145_p0, %p1401_p4  ;;  %p1151_p3 = por %p1150_p1, %p1149_p8 }
 0x154   : > { %p1147_p5 = pneg %p1146_p2 }
 0x156   : > { %p1152_p9 = pnand %p1151_p3, %p1147_p5 }
 0x158   : > { %1155 = shalt.err (!%p1152_p9)
}
 0x159   : > { %s1621_s21 = smov %s1620_s15  ;;  %s641_s17 = sshll.u32 %s1457_s20, 4  ;;  %v567_v30 = vpop.permute.xlu0 %566  ;;  %v572_v31 = vpop.permute.xlu1 %571  ;;  %s642_s17 = int_to_ptr.vmem [resolvable:$true] %s641_s17 }
 0x15a   : > { %881 = dma.vmem_to_hbm [thread:$0]  (%p1401_p4), %s1485_s3, 512, %s1621_s21, %s582_s4, %s1260_s26, %s1260_s26, %s1261_s19  }
 0x15b   : > { %s1622_s15 = scalar_lea.hbm %s1594_s9, %s1468_s2  ;;  %850 = vst.msk [vmem:[%s1457_s20 + $0x8] sm:$0xff] %vm473_vm1, %v567_v30  ;;  %s1176_s2 = scalar_lea.hbm %s1594_s9, 64 }
 0x15c   : > { %s643_s0 = sshll.u32 %s1622_s15, 4  ;;  %851 = vst.msk [vmem:[%s1457_s20 + $0x10] sm:$0xff] %vm473_vm1, %v572_v31  ;;  %s644_s0 = int_to_ptr.hbm [resolvable:$true] %s643_s0 }
 0x15d   : > { %s1170_s1 = sshra.s32 %s644_s0, 4  ;;  %s1171_s1 = int_to_ptr.hbm [resolvable:$true] %s1170_s1 }
 0x15e   : > { %s1172_s5 = scalar_lea.hbm %s1171_s1, 32  ;;  %p1177_p13 = scmp.lt.s32.totalorder %s1171_s1, %s1594_s9 }
 0x15f   : > { %p1173_p10 = scmp.ne.s32.totalorder %s1171_s1, %s1172_s5  ;;  %p1178_p0 = scmp.lt.s32.totalorder %s1176_s2, %s1172_s5 }
 0x161   : > { %p1174_p11 = pnand %p1173_p10, %p1401_p4  ;;  %p1179_p2 = por %p1178_p0, %p1177_p13 }
 0x163   : > { %p1175_p12 = pneg %p1174_p11 }
 0x165   : > { %p1180_p5 = pnand %p1179_p2, %p1175_p12 }
 0x167   : > { %1183 = shalt.err (!%p1180_p5)
}
 0x168   : > { %883 = dma.vmem_to_hbm [thread:$0]  (%p1401_p4), %s642_s17, 512, %s644_s0, %s1501_s24, %s1260_s26, %s1260_s26, %s1261_s19  }
 0x169 PF: > { %s658_s20 = sand.u32 1, %s1230_s30   ;;  %p902_p8 = pnand %p830_p6, %p1409_p7 }
 0x16a   : > { %s659_s28 = scalar_lea.sflag [#allocation4], %s658_s20 }
 0x16b   : > { %p903_p1 = pneg %p902_p8 }
 0x16d   : > { %1221 = dma.done.wait (%p903_p1), %s659_s28, 512  }
 0x16e   : > { %1223 = vsyncadd (%p903_p1), %s659_s28, 4294966784  ;;  %s1623_s22 = sadd.s32 4294967294, %s1250_s14  }
 0x16f   : > { %s668_s27 = sand.u32 1, %s1623_s22  }
 0x170   : > { %s669_s21 = scalar_lea.sflag [#allocation12], %s668_s27 }
 0x171   : > { %1225 = dma.done.wait (%p903_p1), %s669_s21, 1024  }
 0x172   : > { %1227 = vsyncadd (%p903_p1), %s669_s21, 4294966272  ;;  %s31_s14 = sadd.s32 1, %s1250_s14   ;;  %s1624_s16 = sld [smem:[#allocation19_spill]] }
 0x173   : > { %p28_p4 = scmp.ge.s32.totalorder %s31_s14, 4   ;;  %s1625_s30 = smov %s1234_s10 }
 0x174   : > { %s1626_s10 = smov %s1238_s11  ;;  %s1627_s11 = smov %s1407_s29 }
 0x175   : > { %s1628_s12 = smov %s1246_s13  ;;  %30 = sbr.rel (!%p28_p4) target bundleno = 17 (0x11), region = 146 }
 0x178   : > { %s1629_s13 = smov %s1624_s16 }
 0x17a   :  { %685 = vsyncpa [#allocation3], 1 }
 0x17b   :  { %687 = vsyncpa [#allocation3 + $0x1], 1 }
 0x17c   :  { %688 = vsyncpa [#allocation6], 1 }
 0x17d   :  { %689 = vsyncpa [#allocation9], 1 }
 0x17e   :  { %690 = vsyncpa [#allocation4], 1 }
 0x17f   :  { %692 = vsyncpa [#allocation4 + $0x1], 1 }
 0x180   :  { %693 = vsyncpa [#allocation12], 1 }
 0x181   :  { %695 = vsyncpa [#allocation12 + $0x1], 1 }

</bundles_post_ra>
